<compile_context>
chip_gen: v7x
topology: tpu7x:2x2x1
jax: 0.10.0
libtpu: 0.0.40
codegen_flags: <defaults>
</compile_context>

<pallas_src>
import math
import functools

import jax
import jax.numpy as jnp
import numpy as np
from jax.experimental import pallas as pl
from jax.experimental.pallas import tpu as pltpu

LN_EPS = 1e-5
_MIB = 1024 * 1024


def _round_up(x, m):
    return ((x + m - 1) // m) * m


def _vmem_capacity_bytes():
    """Per-TensorCore VMEM capacity; conservative 64 MiB (v7x) fallback."""
    try:
        cap = int(pltpu.get_tpu_info().vmem_capacity_bytes)
        if cap > 0:
            return cap
    except Exception:
        pass
    return 64 * _MIB


def _kernel(x_ref, w_ref, g_ref, b_ref, o_ref, *, d_out_real, resident_w):
    """Grid step (i, c): row tile i, component c.

    x_ref : (TM, d_pad)       bf16 padded input rows for component c
    w_ref : (C, d_pad, Dpad)  bf16 resident weight stack (single-buffered)
            or (d_pad, Dpad)  per-component streamed block (fallback)
    g_ref : (C, 1, Dpad)      f32 gamma_c / C  (resident, zero in padded cols)
    b_ref : (C, 1, Dpad)      f32 beta_c / C, with full_bias/C folded into c=0
    o_ref : (TM, Dpad)        f32 output tile; doubles as the accumulator
                              (resident across the component axis).
    """
    c = pl.program_id(1)
    w = w_ref[c] if resident_w else w_ref[...]

    # Linear (no bias): bf16 MXU matmul with f32 accumulation.
    partial = jnp.dot(x_ref[...], w, preferred_element_type=jnp.float32)

    # LayerNorm over the *real* output dim.  Padded columns of `partial` are
    # exactly zero (padded W columns are zero), so plain sums over the padded
    # tile are exact.  One-pass variance: E[x^2] - mean^2 (clamped at 0).
    inv_d = 1.0 / float(d_out_real)
    s = jnp.sum(partial, axis=-1, keepdims=True)
    ssq = jnp.sum(partial * partial, axis=-1, keepdims=True)
    mean = s * inv_d
    var = jnp.maximum(ssq * inv_d - mean * mean, 0.0)
    inv_std = jax.lax.rsqrt(var + LN_EPS)

    # gamma/beta already carry the 1/C factor (and full_bias/C inside beta_0);
    # padded output columns stay exactly zero.
    term = (partial - mean) * inv_std * g_ref[c] + b_ref[c]

    @pl.when(c == 0)
    def _():
        o_ref[...] = term

    @pl.when(c > 0)
    def _():
        o_ref[...] += term


@functools.partial(jax.jit,
                   static_argnames=("d_out_real", "tm", "resident_w",
                                    "vmem_limit"))
def _pallas_forward(X, W, G, B, *, d_out_real, tm, resident_w, vmem_limit):
    C, N_pad, d_pad = X.shape
    Dpad = W.shape[-1]
    grid = (N_pad // tm, C)

    if resident_w:
        # Whole weight stack resident in VMEM: constant index_map + single
        # buffering -> one weight DMA for the entire kernel.
        w_spec = pl.BlockSpec((C, d_pad, Dpad), lambda i, c: (0, 0, 0),
                              pipeline_mode=pl.Buffered(1))
    else:
        # TODO(synk): ragged-K grid (scalar-prefetched per-component K counts)
        # to avoid padding every component to d_max at production scale.
        w_spec = pl.BlockSpec((None, d_pad, Dpad), lambda i, c: (c, 0, 0))

    # gamma/beta resident and single-buffered; indexed by c inside the kernel.
    gb_spec = pl.BlockSpec((C, 1, Dpad), lambda i, c: (0, 0, 0),
                           pipeline_mode=pl.Buffered(1))

    return pl.pallas_call(
        functools.partial(_kernel, d_out_real=d_out_real,
                          resident_w=resident_w),
        out_shape=jax.ShapeDtypeStruct((N_pad, Dpad), jnp.float32),
        grid_spec=pltpu.PrefetchScalarGridSpec(
            num_scalar_prefetch=0,
            grid=grid,
            in_specs=[
                pl.BlockSpec((None, tm, d_pad), lambda i, c: (c, i, 0)),
                w_spec,
                gb_spec,
                gb_spec,
            ],
            out_specs=pl.BlockSpec((tm, Dpad), lambda i, c: (i, 0)),
        ),
        compiler_params=pltpu.CompilerParams(
            dimension_semantics=("parallel", "arbitrary"),
            vmem_limit_bytes=vmem_limit),
    )(X, W, G, B)


def _vmem_estimate(tm, d_pad, Dpad, C, resident_w):
    x_bytes = 2 * tm * d_pad * 2                       # double-buffered bf16 X
    if resident_w:
        w_bytes = C * d_pad * Dpad * 2                 # single-buffered stack
    else:
        w_bytes = 2 * d_pad * Dpad * 2                 # double-buffered block
    gb_bytes = 2 * C * Dpad * 4                        # resident gamma + beta
    out_bytes = 2 * tm * Dpad * 4                      # double-buffered f32 out
    tmp_bytes = 2 * tm * Dpad * 4                      # f32 partial + partial^2
    return x_bytes + w_bytes + gb_bytes + out_bytes + tmp_bytes


def pack_params(weights, gammas, betas, full_bias):
    """Pack the static parameters ONCE (hoisted out of the per-call path):
    transpose to x @ W layout, zero-pad K/Dout to multiples of 128, fold the
    1/C average into gamma/beta, fold full_bias/C into beta_0, cast W to bf16.

    weights: list of [Dout, d_i] (nn.Linear layout); gammas/betas/full_bias:
    [Dout] each.
    """
    C = len(weights)
    Dout = int(full_bias.shape[0])
    d_max = max(int(w.shape[1]) for w in weights)
    d_pad = _round_up(d_max, 128)
    Dpad = _round_up(Dout, 128)
    inv_c = 1.0 / C

    W = jnp.stack(
        [jnp.pad(w.T, ((0, d_pad - w.shape[1]), (0, Dpad - w.shape[0])))
         for w in weights]).astype(jnp.bfloat16)
    G = jnp.stack([jnp.pad(g * inv_c, (0, Dpad - Dout)) for g in gammas]
                  ).astype(jnp.float32)[:, None, :]
    bs = [betas[0] + full_bias] + list(betas[1:])      # fold shared bias
    B = jnp.stack([jnp.pad(b * inv_c, (0, Dpad - Dout)) for b in bs]
                  ).astype(jnp.float32)[:, None, :]
    return {"W": W, "G": G, "B": B, "C": C, "Dout": Dout,
            "d_pad": d_pad, "Dpad": Dpad}


def multi_input_layernorm_linear(inputs, params, *, tm=None):
    """inputs: list of [N, d_i] f32 arrays; params: output of pack_params().
    Returns [N, Dout] f32, matching the PyTorch module's forward."""
    C = params["C"]
    d_pad, Dpad, Dout = params["d_pad"], params["Dpad"], params["Dout"]
    N = int(inputs[0].shape[0])

    vmem_cap = _vmem_capacity_bytes()
    limit_cap = int(min(vmem_cap - 8 * _MIB, 100 * _MIB))   # ~56 MiB on v7x
    tm_cap = 512 if vmem_cap >= 96 * _MIB else 256           # 512 on 128 MiB chips

    if tm is None:
        n16 = _round_up(N, 16)
        # Aim for >= 2 row tiles (megacore), multiples of 16 (bf16 tile).
        tm = min(tm_cap, max(16, _round_up((n16 + 1) // 2, 16)))
    tm = max(16, _round_up(int(tm), 16))

    # Keep the whole weight stack resident if it fits (with single buffering);
    # otherwise stream per-component blocks.  Shrink tm until the VMEM
    # estimate (including the f32 temporaries) fits the generation budget.
    resident_w = _vmem_estimate(tm, d_pad, Dpad, C, True) <= limit_cap
    while (tm > 16 and
           _vmem_estimate(tm, d_pad, Dpad, C, resident_w) > limit_cap):
        tm = max(16, _round_up(tm // 2, 16))
        resident_w = _vmem_estimate(tm, d_pad, Dpad, C, True) <= limit_cap
    est = _vmem_estimate(tm, d_pad, Dpad, C, resident_w)
    vmem_limit = int(min(limit_cap, max(2 * est, 32 * _MIB)))

    N_pad = _round_up(N, tm)
    # Pack inputs: zero-pad rows/features, cast to bf16 for the MXU.
    # TODO(synk): per-component K (ragged-K via scalar prefetch) to avoid
    # padding every component to d_max and re-materializing X per call.
    X = jnp.stack(
        [jnp.pad(x, ((0, N_pad - N), (0, d_pad - x.shape[1]))) for x in inputs]
    ).astype(jnp.bfloat16)

    out = _pallas_forward(X, params["W"], params["G"], params["B"],
                          d_out_real=Dout, tm=tm, resident_w=resident_w,
                          vmem_limit=vmem_limit)
    if N_pad == N and Dpad == Dout:
        return out
    return out[:N, :Dout]


def init_params(key, input_dims, output_dim):
    """Deterministic parameter init mirroring the module's reset_parameters()."""
    fan_in = sum(input_dims)
    std = math.sqrt(2.0 / float(fan_in + output_dim))
    a = math.sqrt(3.0) * std
    weights = []  # nn.Linear layout: [Dout, d_i]
    for d in input_dims:
        key, sub = jax.random.split(key)
        weights.append(jax.random.uniform(sub, (output_dim, d), jnp.float32, -a, a))
    gammas = [jnp.ones((output_dim,), jnp.float32) for _ in input_dims]
    betas = [jnp.zeros((output_dim,), jnp.float32) for _ in input_dims]
    full_bias = jnp.zeros((output_dim,), jnp.float32)
    return weights, gammas, betas, full_bias


def reference(inputs, weights, gammas, betas, full_bias):
    """Pure-JAX f32 reference matching the PyTorch module."""
    C = len(inputs)
    out = full_bias[None, :]
    for x, w, g, b in zip(inputs, weights, gammas, betas):
        p = x @ w.T
        mean = jnp.mean(p, axis=-1, keepdims=True)
        var = jnp.mean((p - mean) ** 2, axis=-1, keepdims=True)
        out = out + ((p - mean) / jnp.sqrt(var + LN_EPS)) * g + b
    return out / C


if __name__ == "__main__":
    # Small, deterministic problem: 3 components with differing input dims.
    input_dims = [32, 16, 24]
    output_dim = 32
    N = 16  # rows (e.g. nodes/edges)

    key = jax.random.PRNGKey(0)
    key, pkey = jax.random.split(key)
    weights, gammas, betas, full_bias = init_params(pkey, input_dims, output_dim)

    inputs = []
    for d in input_dims:
        key, sub = jax.random.split(key)
        inputs.append(jax.random.normal(sub, (N, d), jnp.float32))

    params = pack_params(weights, gammas, betas, full_bias)  # hoisted: once
    out = multi_input_layernorm_linear(inputs, params)
    out = jax.block_until_ready(out)

    ref = reference(inputs, weights, gammas, betas, full_bias)
    # bf16 MXU operands (f32 accumulation) -> loosened tolerance vs f32 ref.
    np.testing.assert_allclose(np.asarray(out), np.asarray(ref), rtol=3e-2, atol=3e-2)

    print("KERNEL_OK")
</pallas_src>

<mosaic_0001>
module attributes {stable_mosaic.version = 11 : i64} {
  func.func @_kernel(%arg0: i32, %arg1: i32, %arg2: memref<1x16x128xbf16, #tpu.memory_space<vmem>>, %arg3: memref<3x128x128xbf16, #tpu.memory_space<vmem>>, %arg4: memref<3x1x128xf32, #tpu.memory_space<vmem>>, %arg5: memref<3x1x128xf32, #tpu.memory_space<vmem>>, %arg6: memref<16x128xf32, #tpu.memory_space<vmem>>) attributes {dimension_semantics = [#tpu.dimension_semantics<parallel>, #tpu.dimension_semantics<arbitrary>], iteration_bounds = array<i64: 1, 3>, scalar_prefetch = 0 : i64, scratch_operands = 0 : i64, tpu.core_type = #tpu.core_type<tc>, window_params = [{transform_indices = @transform_0, window_bounds = array<i64: 1, 16, 128>}, {pipeline_mode = #tpu.pipeline_mode<synchronous>, transform_indices = @transform_1, window_bounds = array<i64: 3, 128, 128>}, {pipeline_mode = #tpu.pipeline_mode<synchronous>, transform_indices = @transform_2, window_bounds = array<i64: 3, 1, 128>}, {pipeline_mode = #tpu.pipeline_mode<synchronous>, transform_indices = @transform_3, window_bounds = array<i64: 3, 1, 128>}, {transform_indices = @transform_4, window_bounds = array<i64: 16, 128>}]} {
    %0 = arith.index_cast %arg1 : i32 to index
    %c0 = arith.constant 0 : index
    %c0_0 = arith.constant 0 : index
    %1 = vector.load %arg3[%0, %c0, %c0_0] : memref<3x128x128xbf16, #tpu.memory_space<vmem>>, vector<1x128x128xbf16>
    %2 = vector.shape_cast %1 : vector<1x128x128xbf16> to vector<128x128xbf16>
    %c0_1 = arith.constant 0 : index
    %c0_2 = arith.constant 0 : index
    %c0_3 = arith.constant 0 : index
    %3 = vector.load %arg2[%c0_1, %c0_2, %c0_3] : memref<1x16x128xbf16, #tpu.memory_space<vmem>>, vector<1x16x128xbf16>
    %4 = vector.shape_cast %3 : vector<1x16x128xbf16> to vector<16x128xbf16>
    %cst = arith.constant dense<0.000000e+00> : vector<16x128xf32>
    %5 = tpu.matmul %4, %2, %cst {dimension_numbers = #tpu.dot_dimension_numbers<[1], [0], [0], [1], [0, 0, 1, 1], [], []>} : vector<16x128xbf16>, vector<128x128xbf16>, vector<16x128xf32> -> vector<16x128xf32>
    %cst_4 = arith.constant dense<0.000000e+00> : vector<16xf32>
    %6 = vector.multi_reduction <add>, %5, %cst_4 [1] : vector<16x128xf32> to vector<16xf32>
    %7 = vector.shape_cast %6 : vector<16xf32> to vector<16x1xf32>
    %8 = arith.mulf %5, %5 : vector<16x128xf32>
    %cst_5 = arith.constant dense<0.000000e+00> : vector<16xf32>
    %9 = vector.multi_reduction <add>, %8, %cst_5 [1] : vector<16x128xf32> to vector<16xf32>
    %10 = vector.shape_cast %9 : vector<16xf32> to vector<16x1xf32>
    %cst_6 = arith.constant 3.125000e-02 : f32
    %11 = vector.broadcast %cst_6 : f32 to vector<16x1xf32>
    %12 = arith.mulf %7, %11 : vector<16x1xf32>
    %cst_7 = arith.constant 3.125000e-02 : f32
    %13 = vector.broadcast %cst_7 : f32 to vector<16x1xf32>
    %14 = arith.mulf %10, %13 : vector<16x1xf32>
    %15 = arith.mulf %12, %12 : vector<16x1xf32>
    %16 = arith.subf %14, %15 : vector<16x1xf32>
    %cst_8 = arith.constant 0.000000e+00 : f32
    %17 = vector.broadcast %cst_8 : f32 to vector<16x1xf32>
    %18 = arith.maximumf %16, %17 : vector<16x1xf32>
    %cst_9 = arith.constant 9.99999974E-6 : f32
    %19 = vector.broadcast %cst_9 : f32 to vector<16x1xf32>
    %20 = arith.addf %18, %19 : vector<16x1xf32>
    %21 = math.rsqrt %20 : vector<16x1xf32>
    %22 = vector.broadcast %12 : vector<16x1xf32> to vector<16x128xf32>
    %23 = arith.subf %5, %22 : vector<16x128xf32>
    %24 = vector.broadcast %21 : vector<16x1xf32> to vector<16x128xf32>
    %25 = arith.mulf %23, %24 : vector<16x128xf32>
    %26 = arith.index_cast %arg1 : i32 to index
    %c0_10 = arith.constant 0 : index
    %c0_11 = arith.constant 0 : index
    %27 = vector.load %arg4[%26, %c0_10, %c0_11] : memref<3x1x128xf32, #tpu.memory_space<vmem>>, vector<1x1x128xf32>
    %28 = vector.shape_cast %27 : vector<1x1x128xf32> to vector<1x128xf32>
    %29 = vector.broadcast %28 : vector<1x128xf32> to vector<16x128xf32>
    %30 = arith.mulf %25, %29 : vector<16x128xf32>
    %31 = arith.index_cast %arg1 : i32 to index
    %c0_12 = arith.constant 0 : index
    %c0_13 = arith.constant 0 : index
    %32 = vector.load %arg5[%31, %c0_12, %c0_13] : memref<3x1x128xf32, #tpu.memory_space<vmem>>, vector<1x1x128xf32>
    %33 = vector.shape_cast %32 : vector<1x1x128xf32> to vector<1x128xf32>
    %34 = vector.broadcast %33 : vector<1x128xf32> to vector<16x128xf32>
    %35 = arith.addf %30, %34 : vector<16x128xf32>
    %c0_i32 = arith.constant 0 : i32
    %36 = arith.cmpi eq, %arg1, %c0_i32 : i32
    %37 = arith.extui %36 : i1 to i32
    %c0_i32_14 = arith.constant 0 : i32
    %38 = arith.cmpi ne, %37, %c0_i32_14 : i32
    scf.if %38 {
      %c0_17 = arith.constant 0 : index
      %c0_18 = arith.constant 0 : index
      %42 = vector.load %arg6[%c0_17, %c0_18] : memref<16x128xf32, #tpu.memory_space<vmem>>, vector<16x128xf32>
      tpu.vector_store %arg6[%c0_17, %c0_18], %35 {strides = array<i32>} : memref<16x128xf32, #tpu.memory_space<vmem>>, vector<16x128xf32>,
    } else {
    }
    %c0_i32_15 = arith.constant 0 : i32
    %39 = arith.cmpi sgt, %arg1, %c0_i32_15 : i32
    %40 = arith.extui %39 : i1 to i32
    %c0_i32_16 = arith.constant 0 : i32
    %41 = arith.cmpi ne, %40, %c0_i32_16 : i32
    scf.if %41 {
      %c0_17 = arith.constant 0 : index
      %c0_18 = arith.constant 0 : index
      %42 = vector.load %arg6[%c0_17, %c0_18] : memref<16x128xf32, #tpu.memory_space<vmem>>, vector<16x128xf32>
      %43 = arith.addf %42, %35 : vector<16x128xf32>
      %c0_19 = arith.constant 0 : index
      %c0_20 = arith.constant 0 : index
      %44 = vector.load %arg6[%c0_19, %c0_20] : memref<16x128xf32, #tpu.memory_space<vmem>>, vector<16x128xf32>
      tpu.vector_store %arg6[%c0_19, %c0_20], %43 {strides = array<i32>} : memref<16x128xf32, #tpu.memory_space<vmem>>, vector<16x128xf32>,
    } else {
    }
    return
  }
  func.func @transform_0(%arg0: i32, %arg1: i32) -> (i32, i32, i32) {
    %c0_i32 = arith.constant 0 : i32
    %c0_i32_0 = arith.constant 0 : i32
    return %arg1, %arg0, %c0_i32 : i32, i32, i32
  }
  func.func @transform_1(%arg0: i32, %arg1: i32) -> (i32, i32, i32) {
    %c0_i32 = arith.constant 0 : i32
    %c0_i32_0 = arith.constant 0 : i32
    %c0_i32_1 = arith.constant 0 : i32
    %c0_i32_2 = arith.constant 0 : i32
    return %c0_i32, %c0_i32_0, %c0_i32_1 : i32, i32, i32
  }
  func.func @transform_2(%arg0: i32, %arg1: i32) -> (i32, i32, i32) {
    %c0_i32 = arith.constant 0 : i32
    %c0_i32_0 = arith.constant 0 : i32
    %c0_i32_1 = arith.constant 0 : i32
    %c0_i32_2 = arith.constant 0 : i32
    return %c0_i32, %c0_i32_0, %c0_i32_1 : i32, i32, i32
  }
  func.func @transform_3(%arg0: i32, %arg1: i32) -> (i32, i32, i32) {
    %c0_i32 = arith.constant 0 : i32
    %c0_i32_0 = arith.constant 0 : i32
    %c0_i32_1 = arith.constant 0 : i32
    %c0_i32_2 = arith.constant 0 : i32
    return %c0_i32, %c0_i32_0, %c0_i32_1 : i32, i32, i32
  }
  func.func @transform_4(%arg0: i32, %arg1: i32) -> (i32, i32) {
    %c0_i32 = arith.constant 0 : i32
    %c0_i32_0 = arith.constant 0 : i32
    return %arg0, %c0_i32 : i32, i32
  }
}

</mosaic_0001>

<bundles_post_ra>
// kernel: _pallas_forward.1
= control target key start
LH: loop header
LB: loop body
LE: loop exit
PB: predicated region body
PF: predicated region fallthrough
CT: control target
= control target key end

     0   :  { %9 = vsyncpa [#allocation3], 0  ;;  %s1048_s0 = inlined_call_operand.hbm [shape: bf16[3,16,128], index: 0, kind: input, shape index: {}]   ;;  %s1049_s1 = inlined_call_operand.hbm [shape: bf16[3,128,128], index: 1, kind: input, shape index: {}]   ;;  %s1050_s2 = inlined_call_operand.vmem [shape: f32[3,1,128], index: 2, kind: input, shape index: {}]   ;;  %s1051_s3 = inlined_call_operand.vmem [shape: f32[3,1,128], index: 3, kind: input, shape index: {}]   ;;  %s1052_s4 = inlined_call_operand.hbm [shape: f32[16,128], index: 4, kind: output, shape index: {}]  }
   0x1   :  { %11 = vsyncpa [#allocation3 + $0x1], 0 }
   0x2   :  { %12 = vsyncpa [#allocation6], 0 }
   0x3   :  { %13 = vsyncpa [#allocation4], 0  ;;  %s843_s15 = smov 0   ;;  %s845_s16 = smov 0  }
   0x4   :  { %s847_s17 = smov 0   ;;  %s849_s18 = smov 0  }
   0x5   :  { %s851_s19 = smov 0   ;;  %s853_s20 = smov 0  }
   0x6 LB: > { %s513_s21 = sadd.s32 4294967295, %s807_s20   ;;  %p53_p0 = scmp.ne.s32.totalorder %s791_s16, %s787_s15  ;;  %s807_s20 = sphi %s853_s20, %s19_s20   ;;  %s803_s19 = sphi %s851_s19, %s1070_s19   ;;  %s799_s18 = sphi %s849_s18, %s1069_s18   ;;  %s795_s17 = sphi %s847_s17, %s1068_s17   ;;  %s791_s16 = sphi %s845_s16, %s1067_s16   ;;  %s787_s15 = sphi %s843_s15, %s1066_s15  }
   0x7   : > { %p875_p1 = scmp.eq.s32.totalorder %s513_s21, 0  ;;  %p514_p2 = scmp.ge.s32.totalorder %s807_s20, 1 }
   0x8   : > { %p153_p3 = scmp.lt.s32.totalorder %s807_s20, 4  ;;  %s809_s25 = smov [#allocation5]  }
   0x9   : > { %s1057_s22 = scalar_select %p875_p1, 1, 0 }
   0xa   : > { %p883_p4 = por %p875_p1, %p53_p0  ;;  %p887_p5 = pnand %p514_p2, %p153_p3 }
   0xb   : > { %s165_s26 = sshll.u32 %s809_s25, 4  ;;  %s28_s28 = sadd.s32 1, %s803_s19  ;;  %s166_s26 = int_to_ptr.vmem [resolvable:$true] %s165_s26 }
   0xc   : > { %s1058_s23 = scalar_select %p883_p4, 1, 0 }
   0xd   : > { %s1059_s24 = scalar_select %p887_p5, 1, 0 }
   0xe   : > { %p583_p6 = pneg %p887_p5  ;;  %s665_s5 = scalar_lea.hbm %s1049_s1, 3072 }
   0xf   : > { %p666_p8 = scmp.ne.s32.totalorder %s1049_s1, %s665_s5  ;;  %p672_p12 = scmp.lt.u32.totalorder %s665_s5, %s1049_s1 }
  0x10   : > { %p895_p7 = pnand %p583_p6, %p875_p1 }
  0x12   : > { %p667_p9 = pneg %p895_p7 }
  0x14   : > { %p668_p10 = pnand %p667_p9, %p666_p8 }
  0x16   : > { %p669_p11 = pneg %p668_p10 }
  0x18   : > { %p674_p13 = pnand %p672_p12, %p669_p11 }
  0x1a   : > { %677 = shalt.err (!%p674_p13)
}
  0x1b   : > { %s678_s10 = scalar_lea.vmem %s166_s26, 3072  ;;  %p686_p6 = scmp.lt.s32.totalorder %s166_s26, %s166_s26 }
  0x1c   : > { %p679_p0 = scmp.ne.s32.totalorder %s166_s26, %s678_s10  ;;  %p687_p1 = scmp.lt.s32.totalorder %s678_s10, %s678_s10 }
  0x1e   : > { %p681_p2 = pnand %p679_p0, %p667_p9  ;;  %p688_p4 = por %p687_p1, %p686_p6 }
  0x20   : > { %p682_p3 = pneg %p681_p2 }
  0x22   : > { %p689_p5 = pnand %p688_p4, %p682_p3 }
  0x24   : > { %692 = shalt.err (!%p689_p5)
}
  0x25   : > { %s810_s11 = smov 64   ;;  %s811_s12 = smov 4  }
  0x26   : > { %586 = dma.hbm_to_vmem [thread:$0]  (!%p895_p7), %s1049_s1, 3072, %s166_s26, [#allocation6], %s810_s11, %s810_s11, %s811_s12  }
  0x27   : > { %p29_p1 = scmp.ge.s32.totalorder %s28_s28, 3  ;;  %s40_s15 = sadd.s32 1, %s795_s17 }
  0x28   : > { %p47_p4 = scmp.ne.s32.totalorder %s795_s17, %s791_s16  ;;  %p48_p5 = scmp.eq.s32.totalorder %s807_s20, 0 }
  0x29   : > { %s1072_s28 = smov (%p29_p1, %s28_s28), 0  ;;  %p592_p9 = scmp.lt.s32.totalorder %s807_s20, 3 }
  0x2a   : > { %p49_p8 = por %p48_p5, %p47_p4  ;;  %s35_s25 = ssub.s32 %s803_s19, %s1072_s28 }
  0x2b   : > { %s185_s29 = sand.u32 1, %s795_s17   ;;  %p38_p10 = scmp.eq.s32.totalorder %s35_s25, 0 }
  0x2c   : > { %s517_s27 = sshll.u32 %s185_s29, 3  ;;  %s542_s30 = sshll.u32 %s803_s19, 7 }
  0x2d   : > { %s931_s5 = scalar_select %p38_p10, %s795_s17, %s40_s15  }
  0x2e   : > { %s936_s26 = scalar_lea.hbm %s1048_s0, %s542_s30  ;;  %s189_s8 = scalar_lea.vmem [#allocation2], %s517_s27 }
  0x2f   : > { %s198_s9 = sshll.u32 %s189_s8, 4  ;;  %p938_p7 = pnand %p592_p9, %p49_p8  ;;  %s942_s9 = int_to_ptr.vmem [resolvable:$true] %s198_s9 }
  0x30   : > { %s944_s13 = scalar_lea.sflag [#allocation3], %s185_s29  ;;  %s693_s14 = scalar_lea.hbm %s936_s26, 128 }
  0x31   : > { %p694_p11 = scmp.ne.s32.totalorder %s936_s26, %s693_s14  ;;  %p695_p12 = pneg %p938_p7 }
  0x32   : > { %s698_s27 = scalar_lea.hbm %s1048_s0, 384  ;;  %p699_p2 = scmp.lt.u32.totalorder %s936_s26, %s1048_s0 }
  0x33   : > { %p696_p13 = pnand %p695_p12, %p694_p11  ;;  %p700_p3 = scmp.lt.u32.totalorder %s698_s27, %s693_s14 }
  0x34   : > { %p702_p1 = scmp.lt.u32.totalorder %s693_s14, %s936_s26 }
  0x35   : > { %p697_p0 = pneg %p696_p13  ;;  %p701_p6 = por %p700_p3, %p699_p2 }
  0x37   : > { %p703_p4 = por %p702_p1, %p701_p6 }
  0x39   : > { %p704_p5 = pnand %p703_p4, %p697_p0 }
  0x3b   : > { %707 = shalt.err (!%p704_p5)
}
  0x3c   : > { %s708_s29 = scalar_lea.vmem %s942_s9, 128  ;;  %s812_s7 = smov [#allocation2]  }
  0x3d   : > { %p709_p8 = scmp.ne.s32.totalorder %s942_s9, %s708_s29  ;;  %s713_s8 = sshll.u32 %s812_s7, 4  ;;  %s714_s8 = int_to_ptr.vmem [resolvable:$false] %s713_s8 }
  0x3e   : > { %s715_s15 = scalar_lea.vmem %s714_s8, 256  ;;  %p716_p11 = scmp.lt.s32.totalorder %s942_s9, %s714_s8 }
  0x3f   : > { %p711_p9 = pnand %p709_p8, %p695_p12  ;;  %p717_p13 = scmp.lt.s32.totalorder %s715_s15, %s708_s29 }
  0x41   : > { %p712_p10 = pneg %p711_p9  ;;  %p718_p2 = por %p717_p13, %p716_p11 }
  0x43   : > { %p719_p3 = pnand %p718_p2, %p712_p10 }
  0x45   : > { %722 = shalt.err (!%p719_p3)
}
  0x46   : > { %590 = dma.hbm_to_vmem [thread:$0]  (!%p938_p7), %s936_s26, 128, %s942_s9, %s944_s13, %s810_s11, %s810_s11, %s811_s12  }
  0x47   : > { %p1062_p12 = scmp.ne.s32.totalorder %s1059_s24, 0 }
  0x48   : > { %s212_s14 = sand.u32 (!%p1062_p12), 1, %s791_s16   ;;  %p1063_p0 = scmp.ne.s32.totalorder (!%p1062_p12), %s1058_s23, 0 }
  0x49   : > { %210 = sbr.rel (%p1062_p12) target bundleno = 540 (0x21c), region = 36  ;;  %s978_s25 = sshll.u32 (!%p1062_p12), %s212_s14, 3 }
  0x4a   : > { %s213_s27 = scalar_lea.sflag (!%p1062_p12), [#allocation3], %s212_s14  ;;  %s216_s30 = scalar_lea.vmem (!%p1062_p12), [#allocation2], %s978_s25 }
  0x50   : > { %774 = dma.done.wait (%p1063_p0), %s213_s27, 128  }
  0x51   : > { %776 = vsyncadd (%p1063_p0), %s213_s27, 4294967168  ;;  %p1064_p6 = scmp.ne.s32.totalorder %s1057_s22, 0 }
  0x53   : > { %778 = dma.done.wait (%p1064_p6), [#allocation6], 3072  }
  0x54   : > { %780 = vsyncadd (%p1064_p6), [#allocation6], 4294964224  ;;  %v813_v0 = vmov 0.0   ;;  %s543_s24 = sshll.u32 %s799_s18, 6  ;;  %vm814_vm0 = vmmov 0   ;;  %v660_v9 = vld [vmem:[%s216_s30] sm:$0xff]   ;;  %s387_s12 = scalar_lea.vmem %s1050_s2, %s799_s18 }
  0x55   : > { %553 = vmatprep.subr.bf16.mxu0 %v813_v0  ;;  %569 = vmatprep.mubr.msk.bf16.mxu0 %vm814_vm0, %v813_v0  ;;  %s245_s11 = scalar_lea.vmem [#allocation5], %s543_s24  ;;  %s397_s10 = scalar_lea.vmem %s1051_s3, %s799_s18  ;;  %v534_v34 = vld [vmem:[%s387_s12] ss:$0 sm:$0xff] }
  0x56   : > { %v652_v1 = vld [vmem:[%s245_s11] sm:$0xff]   ;;  %v653_v2 = vld [vmem:[%s245_s11 + $0x8] sm:$0xff]   ;;  %v654_v3 = vld [vmem:[%s245_s11 + $0x10] sm:$0xff]   ;;  %p536_p7 = scmp.ne.s32.totalorder %s799_s18, 0 }
  0x57   : > { %554 = vmatpush3.bf16.msra.mxu0 %v652_v1  ;;  %v655_v4 = vld [vmem:[%s245_s11 + $0x18] sm:$0xff]   ;;  %v656_v5 = vld [vmem:[%s245_s11 + $0x20] sm:$0xff]   ;;  %v657_v6 = vld [vmem:[%s245_s11 + $0x28] sm:$0xff]  }
  0x58   : > { %555 = vmatprep.subr.bf16.mxu0 %v813_v0  ;;  %v658_v7 = vld [vmem:[%s245_s11 + $0x30] sm:$0xff]   ;;  %v659_v8 = vld [vmem:[%s245_s11 + $0x38] sm:$0xff]   ;;  %v535_v36 = vld [vmem:[%s397_s10] ss:$0 sm:$0xff] }
  0x5b   : > { %556 = vmatpush3.bf16.msra.mxu0 %v653_v2 }
  0x5c   : > { %557 = vmatprep.subr.bf16.mxu0 %v813_v0 }
  0x5f   : > { %558 = vmatpush3.bf16.msra.mxu0 %v654_v3 }
  0x60   : > { %559 = vmatprep.subr.bf16.mxu0 %v813_v0 }
  0x63   : > { %560 = vmatpush3.bf16.msra.mxu0 %v655_v4 }
  0x64   : > { %561 = vmatprep.subr.bf16.mxu0 %v813_v0 }
  0x67   : > { %562 = vmatpush3.bf16.msra.mxu0 %v656_v5 }
  0x68   : > { %563 = vmatprep.subr.bf16.mxu0 %v813_v0 }
  0x6b   : > { %564 = vmatpush3.bf16.msra.mxu0 %v657_v6 }
  0x6c   : > { %565 = vmatprep.subr.bf16.mxu0 %v813_v0 }
  0x6f   : > { %566 = vmatpush3.bf16.msra.mxu0 %v658_v7 }
  0x70   : > { %567 = vmatprep.subr.bf16.mxu0 %v813_v0 }
  0x73   : > { %568 = vmatpush3.bf16.msra.mxu0 %v659_v8 }
  0x76   : > { %570 = vmatmul.mubr.bf16.vlgmr.msra.gmra.mrb[0].mxu0 %v660_v9 }
 0x149   : > { %v352_v10 = vpop.f32.mrb[0].mxu0 }
 0x14a   : > { %359 = vadd.xlane.f32.xlu0 %v352_v10  ;;  %v571_v11 = vpop.f32.mrb[1].mxu0  ;;  %v363_v12 = vmul.f32 %v352_v10, %v352_v10 }
 0x14b   : > { %v355_v13 = vpop.f32.mrb[2].mxu0 }
 0x14c   : > { %365 = vadd.xlane.f32.xlu1 %v363_v12  ;;  %v572_v14 = vpop.f32.mrb[3].mxu0  ;;  %v364_v15 = vmul.f32 %v355_v13, %v355_v13 }
 0x14e   : > { %361 = vadd.xlane.f32.xlu0 %v355_v13 }
 0x150   : > { %367 = vadd.xlane.f32.xlu1 %v364_v15 }
 0x1d7   : > { %v360_v16 = vpop.xlane.xlu0 %359 }
 0x1d8   : > { %v369_v17 = vmul.f32 0.03125, %v360_v16 }
 0x1d9   : > { %v366_v18 = vpop.xlane.xlu1 %365 }
 0x1da   : > { %v373_v19 = vmul.f32 %v369_v17, %v369_v17  ;;  %v371_v20 = vmul.f32 0.03125, %v366_v18  ;;  %v383_v32 = vsub.f32 %v352_v10, %v369_v17 }
 0x1db   : > { %v362_v21 = vpop.xlane.xlu0 %361 }
 0x1dc   : > { %v375_v22 = vsub.f32 %v371_v20, %v373_v19  ;;  %v370_v23 = vmul.f32 0.03125, %v362_v21 }
 0x1dd   : > { %v368_v24 = vpop.xlane.xlu1 %367 }
 0x1de   : > { %v377_v25 = vmax.f32 %v375_v22, 0.0  ;;  %v374_v26 = vmul.f32 %v370_v23, %v370_v23  ;;  %v372_v27 = vmul.f32 0.03125, %v368_v24  ;;  %v384_v38 = vsub.f32 %v355_v13, %v370_v23 }
 0x1e0   : > { %v379_v28 = vadd.f32 1e-05, %v377_v25  ;;  %v376_v29 = vsub.f32 %v372_v27, %v374_v26 }
 0x1e2   : > { %661 = vrsqrt.f32 %v379_v28  ;;  %v378_v30 = vmax.f32 %v376_v29, 0.0 }
 0x1e4   : > { %v380_v31 = vadd.f32 1e-05, %v378_v30 }
 0x1e6   : > { %663 = vrsqrt.f32 %v380_v31 }
 0x1ec   : > { %v662_v33 = vpop.eup %661 }
 0x1ed   : > { %v385_v35 = vmul.f32 %v662_v33, %v383_v32 }
 0x1ef   : > { %v395_v37 = vmul.f32 %v534_v34, %v385_v35  ;;  %410 = sbr.rel (%p536_p7) target bundleno = 504 (0x1f8), region = 48 }
 0x1f0   : > { %v664_v39 = vpop.eup %663 }
 0x1f1   : > { %v405_v40 = vadd.f32 %v535_v36, %v395_v37  ;;  %v386_v41 = vmul.f32 %v664_v39, %v384_v38 }
 0x1f3   : > { %v396_v42 = vmul.f32 %v534_v34, %v386_v41  ;;  %411 = vst [vmem:[#allocation7] sm:$0xff] (!%p536_p7), %v405_v40 }
 0x1f5   : > { %v406_v43 = vadd.f32 %v535_v36, %v396_v42 }
 0x1f7   : > { %412 = vst [vmem:[#allocation7 + $0x8] sm:$0xff] %v406_v43 }
 0x1f8 PF: > { %p537_p1 = scmp.le.s32.totalorder %s799_s18, 0 }
 0x1fa   : > { %416 = sbr.rel (%p537_p1) target bundleno = 514 (0x202), region = 52 }
 0x1fc   : > { %v417_v44 = vld [vmem:[#allocation7] sm:$0xff] (!%p537_p1) }
 0x1fd   : > { %v419_v46 = vadd.f32 (!%p537_p1), %v417_v44, %v405_v40 }
 0x1fe   : > { %v418_v45 = vld [vmem:[#allocation7 + $0x8] sm:$0xff] (!%p537_p1) }
 0x1ff   : > { %v420_v47 = vadd.f32 (!%p537_p1), %v418_v45, %v406_v43  ;;  %421 = vst [vmem:[#allocation7] sm:$0xff] (!%p537_p1), %v419_v46 }
 0x201   : > { %422 = vst [vmem:[#allocation7 + $0x8] sm:$0xff] %v420_v47 }
 0x202 PF: > { %p1004_p4 = scmp.eq.s32.totalorder %s513_s21, 2  ;;  %s815_s6 = smov [#allocation7]  }
 0x203   : > { %s432_s29 = sshll.u32 %s815_s6, 4  ;;  %s433_s29 = int_to_ptr.vmem [resolvable:$true] %s432_s29 }
 0x204   : > { %s723_s7 = scalar_lea.vmem %s433_s29, 256  ;;  %p730_p10 = scmp.lt.s32.totalorder %s433_s29, %s433_s29 }
 0x205   : > { %p724_p5 = scmp.ne.s32.totalorder %s433_s29, %s723_s7  ;;  %p731_p11 = scmp.lt.s32.totalorder %s723_s7, %s723_s7 }
 0x207   : > { %p725_p8 = pnand %p724_p5, %p1004_p4  ;;  %p732_p13 = por %p731_p11, %p730_p10 }
 0x209   : > { %p726_p9 = pneg %p725_p8 }
 0x20b   : > { %p733_p2 = pnand %p732_p13, %p726_p9 }
 0x20d   : > { %736 = shalt.err (!%p733_p2)
}
 0x20e   : > { %s737_s21 = scalar_lea.hbm %s1052_s4, 256 }
 0x20f   : > { %p738_p3 = scmp.ne.s32.totalorder %s1052_s4, %s737_s21  ;;  %p743_p6 = scmp.lt.u32.totalorder %s737_s21, %s1052_s4 }
 0x211   : > { %p739_p12 = pnand %p738_p3, %p1004_p4 }
 0x213   : > { %p740_p0 = pneg %p739_p12 }
 0x215   : > { %p745_p7 = pnand %p743_p6, %p740_p0 }
 0x217   : > { %748 = shalt.err (!%p745_p7)
}
 0x218   : > { %s816_s30 = smov 128   ;;  %s817_s24 = smov 8  }
 0x219   : > { %580 = dma.vmem_to_hbm [thread:$0]  (%p1004_p4), %s433_s29, 256, %s1052_s4, [#allocation4], %s816_s30, %s816_s30, %s817_s24  }
 0x21a   : > { %782 = dma.done.wait (%p1004_p4), [#allocation4], 256  }
 0x21b   : > { %784 = vsyncadd (%p1004_p4), [#allocation4], 4294967040 }
 0x21c PF: > { %s19_s20 = sadd.s32 1, %s807_s20   ;;  %s1066_s15 = smov %s791_s16 }
 0x21d   : > { %p16_p1 = scmp.ge.s32.totalorder %s19_s20, 5   ;;  %s1067_s16 = smov %s795_s17 }
 0x21e   : > { %s1068_s17 = smov %s931_s5  ;;  %s1069_s18 = smov %s803_s19 }
 0x21f   : > { %s1070_s19 = smov %s1072_s28  ;;  %18 = sbr.rel (!%p16_p1) target bundleno = 6 (0x6), region = 89 }
 0x226   :  { %448 = vsyncpa [#allocation3], 1 }
 0x227   :  { %450 = vsyncpa [#allocation3 + $0x1], 1 }
 0x228   :  { %451 = vsyncpa [#allocation6], 1 }
 0x229   :  { %452 = vsyncpa [#allocation4], 1 }
 0x22a   :  { %454 = vsyncpa [#allocation4 + $0x1], 1 }

</bundles_post_ra>
